<compile_context>
chip_gen: v7x
topology: tpu7x:2x2x1
jax: 0.10.0
libtpu: 0.0.40
codegen_flags: <defaults>
</compile_context>

<pallas_src>
import functools

import jax
import jax.numpy as jnp
from jax.experimental import pallas as pl
from jax.experimental.pallas import tpu as pltpu


# ----------------------------------------------------------------------------
# Fused Pallas kernel: 3 x (ChebConv(K) + bias + ReLU), then Linear.
# ----------------------------------------------------------------------------
def _chebnet_kernel(lhat_ref, x_ref,
                    w1_ref, b1_ref, w2_ref, b2_ref, w3_ref, b3_ref,
                    wf_ref, bf_ref,
                    o_ref,
                    *, K):
    """Shapes (all VMEM):
      lhat_ref: (N, N) bf16              x_ref: (N, Cin_pad) f32
      w{1,2,3}_ref: (K*Cin_l, 64) bf16   b{1,2,3}_ref: (1, 64) f32
      wf_ref: (64, Cout_pad) bf16        bf_ref: (1, Cout_pad) f32
      o_ref: (N, Cout_pad) f32
    """
    lhat = lhat_ref[...]                                    # (N, N) bf16, loaded once

    def cheb_layer(h, w_ref, b_ref):
        # h: (N, cin) f32. Chebyshev recurrence state stays f32; each T_k is
        # cast to bf16 exactly once and reused as both the next recurrence's
        # MXU operand and its slot in the stacked deep-matmul operand.
        tx_prev = h                                         # T_0(L) h  (f32)
        parts = [tx_prev.astype(jnp.bfloat16)]
        if K > 1:
            tx_cur = jnp.dot(lhat, parts[0],                # T_1(L) h
                             preferred_element_type=jnp.float32)
            cur_bf16 = tx_cur.astype(jnp.bfloat16)
            parts.append(cur_bf16)
            for _ in range(2, K):                           # static unroll
                tx_next = (2.0 * jnp.dot(lhat, cur_bf16,
                                         preferred_element_type=jnp.float32)
                           - tx_prev)
                tx_prev, tx_cur = tx_cur, tx_next
                cur_bf16 = tx_cur.astype(jnp.bfloat16)
                parts.append(cur_bf16)
        # One deep matmul over the register-stacked (N, K*cin) features instead
        # of K shallow per-order matmuls (and no VMEM scratch round trip).
        stacked = jnp.concatenate(parts, axis=1) if len(parts) > 1 else parts[0]
        out = jnp.dot(stacked, w_ref[...],
                      preferred_element_type=jnp.float32) + b_ref[...]
        return jnp.maximum(out, 0.0)                        # fused ReLU (f32)

    h = cheb_layer(x_ref[...], w1_ref, b1_ref)
    h = cheb_layer(h, w2_ref, b2_ref)
    h = cheb_layer(h, w3_ref, b3_ref)

    # Fused final Linear epilogue (no separate kernel / HBM round trip).
    o_ref[...] = (jnp.dot(h.astype(jnp.bfloat16), wf_ref[...],
                          preferred_element_type=jnp.float32) + bf_ref[...])


# ----------------------------------------------------------------------------
# Wrapper
# ----------------------------------------------------------------------------
_VMEM = pl.BlockSpec(memory_space=pltpu.MemorySpace.VMEM)


def chebnet_forward(params, x, lhat):
    """x: (N, Cin) f32, lhat: (N, N) f32 -> (N, 1) f32."""
    N, cin = x.shape
    K, _, hidden = params["conv1_w"].shape
    cout = params["fc2_w"].shape[1]

    # Pad the tiny input-channel dim (Cin=1) so per-order tiles are >= 8 lanes
    # wide; zero feature columns x zero weight rows are exact.
    cin_pad = max(cin, 8)
    w1 = params["conv1_w"]
    if cin_pad != cin:
        x = jnp.pad(x, ((0, 0), (0, cin_pad - cin)))
        w1 = jnp.pad(w1, ((0, 0), (0, cin_pad - cin), (0, 0)))

    # Collapse the K per-order weights onto the contraction dim -> (K*Cin, Cout),
    # matching the in-kernel stacked [T_0 h | T_1 h | ... | T_{K-1} h] layout.
    w1s = w1.reshape(K * cin_pad, hidden).astype(jnp.bfloat16)
    w2s = params["conv2_w"].reshape(K * hidden, hidden).astype(jnp.bfloat16)
    w3s = params["conv3_w"].reshape(K * hidden, hidden).astype(jnp.bfloat16)

    # Pad the fused FC output columns to 8 lanes (zero cols), sliced off below.
    cout_pad = max(cout, 8)
    wf = jnp.pad(params["fc2_w"],
                 ((0, 0), (0, cout_pad - cout))).astype(jnp.bfloat16)
    bf = jnp.pad(params["fc2_b"], ((0, cout_pad - cout),)).reshape(1, cout_pad)

    kernel = functools.partial(_chebnet_kernel, K=K)
    out = pl.pallas_call(
        kernel,
        out_shape=jax.ShapeDtypeStruct((N, cout_pad), jnp.float32),
        in_specs=[_VMEM] * 10,
        out_specs=_VMEM,
        compiler_params=pltpu.CompilerParams(
            # Safe on v5e/v6e/v7x; leaves headroom for larger graphs.
            vmem_limit_bytes=32 * 1024 * 1024),
    )(
        lhat.astype(jnp.bfloat16),                       # bf16 MXU operand
        x.astype(jnp.float32),
        w1s, params["conv1_b"].reshape(1, hidden).astype(jnp.float32),
        w2s, params["conv2_b"].reshape(1, hidden).astype(jnp.float32),
        w3s, params["conv3_b"].reshape(1, hidden).astype(jnp.float32),
        wf, bf.astype(jnp.float32),
    )
    return out[:, :cout]


# ----------------------------------------------------------------------------
# Graph preprocessing (plain-JAX glue; matches torch_geometric ChebConv.__norm__
# with normalization='sym', lambda_max=2.0, unweighted, deduplicated edges).
# Built ONCE per static graph and reused across forwards.
# ----------------------------------------------------------------------------
def scaled_laplacian(edge_index, num_nodes, lambda_max=2.0):
    row, col = edge_index
    w = jnp.where(row != col, 1.0, 0.0)                 # drop self loops
    A = jnp.zeros((num_nodes, num_nodes), jnp.float32).at[row, col].add(w)
    deg = A.sum(axis=1)
    dinv = jnp.where(deg > 0.0, 1.0 / jnp.sqrt(jnp.maximum(deg, 1e-30)), 0.0)
    eye = jnp.eye(num_nodes, dtype=jnp.float32)
    L = eye - dinv[:, None] * A * dinv[None, :]         # sym-normalized Laplacian
    return (2.0 / lambda_max) * L - eye                 # L_hat


# ----------------------------------------------------------------------------
# Parameters + pure-f32 reference (for validating the bf16 kernel)
# ----------------------------------------------------------------------------
def init_params(key, S=5, hidden=64):
    ks = jax.random.split(key, 8)

    def glorot(k, shape, fan_in, fan_out):
        lim = jnp.sqrt(6.0 / (fan_in + fan_out))
        return jax.random.uniform(k, shape, jnp.float32, -lim, lim)

    return {
        "conv1_w": glorot(ks[0], (S, 1, hidden), 1, hidden),
        "conv1_b": jnp.zeros((hidden,), jnp.float32),
        "conv2_w": glorot(ks[1], (S, hidden, hidden), hidden, hidden),
        "conv2_b": jnp.zeros((hidden,), jnp.float32),
        "conv3_w": glorot(ks[2], (S, hidden, hidden), hidden, hidden),
        "conv3_b": jnp.zeros((hidden,), jnp.float32),
        "fc2_w": glorot(ks[3], (hidden, 1), hidden, 1),
        "fc2_b": jnp.zeros((1,), jnp.float32),
    }


def chebnet_reference(params, x, lhat):
    """Pure-f32 JAX reference (same math, no Pallas)."""
    K = params["conv1_w"].shape[0]

    def chebconv(h, w, b):
        tx_prev = h
        out = tx_prev @ w[0]
        if K > 1:
            tx_cur = lhat @ h
            out = out + tx_cur @ w[1]
            for k in range(2, K):
                tx_next = 2.0 * (lhat @ tx_cur) - tx_prev
                out = out + tx_next @ w[k]
                tx_prev, tx_cur = tx_cur, tx_next
        return jax.nn.relu(out + b)

    h = chebconv(x, params["conv1_w"], params["conv1_b"])
    h = chebconv(h, params["conv2_w"], params["conv2_b"])
    h = chebconv(h, params["conv3_w"], params["conv3_b"])
    return h @ params["fc2_w"] + params["fc2_b"]


# ----------------------------------------------------------------------------
# Example run
# ----------------------------------------------------------------------------
if __name__ == "__main__":
    key = jax.random.PRNGKey(0)
    k_x, k_p = jax.random.split(key)

    N = 16                                   # number of graph nodes
    x = jax.random.normal(k_x, (N, 1), jnp.float32)   # data.x: (N, 1) node features

    # data.edge_index: undirected ring plus a few chords, shape (2, E).
    # (Edges are assumed deduplicated; duplicates would be double-counted.)
    src = jnp.arange(N, dtype=jnp.int32)
    dst = (src + 1) % N
    extra_r = jnp.array([0, 5, 3, 12], dtype=jnp.int32)
    extra_c = jnp.array([5, 0, 12, 3], dtype=jnp.int32)
    edge_index = jnp.stack([
        jnp.concatenate([src, dst, extra_r]),
        jnp.concatenate([dst, src, extra_c]),
    ])

    params = init_params(k_p, S=5, hidden=64)

    # Static graph: build L_hat once, outside the per-forward path.
    lhat = scaled_laplacian(edge_index, N)

    fwd = jax.jit(chebnet_forward)
    out = fwd(params, x, lhat)               # (N, 1)
    jax.block_until_ready(out)
    assert out.shape == (N, 1) and out.dtype == jnp.float32

    # Validate bf16-MXU / f32-accumulate kernel against the pure-f32 reference.
    ref = chebnet_reference(params, x, lhat)
    rel_err = float(jnp.max(jnp.abs(out - ref)) / (jnp.max(jnp.abs(ref)) + 1e-6))
    assert rel_err < 0.1, f"kernel/reference mismatch: rel_err={rel_err}"

    print("KERNEL_OK")
</pallas_src>

<mosaic_0001>
module attributes {stable_mosaic.version = 11 : i64} {
  func.func @_chebnet_kernel(%arg0: memref<16x16xbf16, #tpu.memory_space<vmem>>, %arg1: memref<16x8xf32, #tpu.memory_space<vmem>>, %arg2: memref<40x64xbf16, #tpu.memory_space<vmem>>, %arg3: memref<1x64xf32, #tpu.memory_space<vmem>>, %arg4: memref<320x64xbf16, #tpu.memory_space<vmem>>, %arg5: memref<1x64xf32, #tpu.memory_space<vmem>>, %arg6: memref<320x64xbf16, #tpu.memory_space<vmem>>, %arg7: memref<1x64xf32, #tpu.memory_space<vmem>>, %arg8: memref<64x8xbf16, #tpu.memory_space<vmem>>, %arg9: memref<1x8xf32, #tpu.memory_space<vmem>>, %arg10: memref<16x8xf32, #tpu.memory_space<vmem>>) attributes {dimension_semantics = [], scalar_prefetch = 0 : i64, scratch_operands = 0 : i64, tpu.core_type = #tpu.core_type<tc>} {
    %c0 = arith.constant 0 : index
    %c0_0 = arith.constant 0 : index
    %0 = vector.load %arg0[%c0, %c0_0] : memref<16x16xbf16, #tpu.memory_space<vmem>>, vector<16x16xbf16>
    %c0_1 = arith.constant 0 : index
    %c0_2 = arith.constant 0 : index
    %1 = vector.load %arg1[%c0_1, %c0_2] : memref<16x8xf32, #tpu.memory_space<vmem>>, vector<16x8xf32>
    %2 = arith.truncf %1 : vector<16x8xf32> to vector<16x8xbf16>
    %cst = arith.constant dense<0.000000e+00> : vector<16x8xf32>
    %3 = tpu.matmul %0, %2, %cst {dimension_numbers = #tpu.dot_dimension_numbers<[1], [0], [0], [1], [0, 0, 1, 1], [], []>} : vector<16x16xbf16>, vector<16x8xbf16>, vector<16x8xf32> -> vector<16x8xf32>
    %4 = arith.truncf %3 : vector<16x8xf32> to vector<16x8xbf16>
    %cst_3 = arith.constant dense<0.000000e+00> : vector<16x8xf32>
    %5 = tpu.matmul %0, %4, %cst_3 {dimension_numbers = #tpu.dot_dimension_numbers<[1], [0], [0], [1], [0, 0, 1, 1], [], []>} : vector<16x16xbf16>, vector<16x8xbf16>, vector<16x8xf32> -> vector<16x8xf32>
    %cst_4 = arith.constant 2.000000e+00 : f32
    %6 = vector.broadcast %cst_4 : f32 to vector<16x8xf32>
    %7 = arith.mulf %6, %5 : vector<16x8xf32>
    %8 = arith.subf %7, %1 : vector<16x8xf32>
    %9 = arith.truncf %8 : vector<16x8xf32> to vector<16x8xbf16>
    %cst_5 = arith.constant dense<0.000000e+00> : vector<16x8xf32>
    %10 = tpu.matmul %0, %9, %cst_5 {dimension_numbers = #tpu.dot_dimension_numbers<[1], [0], [0], [1], [0, 0, 1, 1], [], []>} : vector<16x16xbf16>, vector<16x8xbf16>, vector<16x8xf32> -> vector<16x8xf32>
    %cst_6 = arith.constant 2.000000e+00 : f32
    %11 = vector.broadcast %cst_6 : f32 to vector<16x8xf32>
    %12 = arith.mulf %11, %10 : vector<16x8xf32>
    %13 = arith.subf %12, %3 : vector<16x8xf32>
    %14 = arith.truncf %13 : vector<16x8xf32> to vector<16x8xbf16>
    %cst_7 = arith.constant dense<0.000000e+00> : vector<16x8xf32>
    %15 = tpu.matmul %0, %14, %cst_7 {dimension_numbers = #tpu.dot_dimension_numbers<[1], [0], [0], [1], [0, 0, 1, 1], [], []>} : vector<16x16xbf16>, vector<16x8xbf16>, vector<16x8xf32> -> vector<16x8xf32>
    %cst_8 = arith.constant 2.000000e+00 : f32
    %16 = vector.broadcast %cst_8 : f32 to vector<16x8xf32>
    %17 = arith.mulf %16, %15 : vector<16x8xf32>
    %18 = arith.subf %17, %8 : vector<16x8xf32>
    %19 = arith.truncf %18 : vector<16x8xf32> to vector<16x8xbf16>
    %20 = tpu.concatenate %2, %4, %9, %14, %19 in 1 : vector<16x8xbf16>, vector<16x8xbf16>, vector<16x8xbf16>, vector<16x8xbf16>, vector<16x8xbf16> -> vector<16x40xbf16>
    %c0_9 = arith.constant 0 : index
    %c0_10 = arith.constant 0 : index
    %21 = vector.load %arg2[%c0_9, %c0_10] : memref<40x64xbf16, #tpu.memory_space<vmem>>, vector<40x64xbf16>
    %cst_11 = arith.constant dense<0.000000e+00> : vector<16x64xf32>
    %22 = tpu.matmul %20, %21, %cst_11 {dimension_numbers = #tpu.dot_dimension_numbers<[1], [0], [0], [1], [0, 0, 1, 1], [], []>} : vector<16x40xbf16>, vector<40x64xbf16>, vector<16x64xf32> -> vector<16x64xf32>
    %c0_12 = arith.constant 0 : index
    %c0_13 = arith.constant 0 : index
    %23 = vector.load %arg3[%c0_12, %c0_13] : memref<1x64xf32, #tpu.memory_space<vmem>>, vector<1x64xf32>
    %24 = vector.broadcast %23 : vector<1x64xf32> to vector<16x64xf32>
    %25 = arith.addf %22, %24 : vector<16x64xf32>
    %cst_14 = arith.constant 0.000000e+00 : f32
    %26 = vector.broadcast %cst_14 : f32 to vector<16x64xf32>
    %27 = arith.maximumf %25, %26 : vector<16x64xf32>
    %28 = arith.truncf %27 : vector<16x64xf32> to vector<16x64xbf16>
    %cst_15 = arith.constant dense<0.000000e+00> : vector<16x64xf32>
    %29 = tpu.matmul %0, %28, %cst_15 {dimension_numbers = #tpu.dot_dimension_numbers<[1], [0], [0], [1], [0, 0, 1, 1], [], []>} : vector<16x16xbf16>, vector<16x64xbf16>, vector<16x64xf32> -> vector<16x64xf32>
    %30 = arith.truncf %29 : vector<16x64xf32> to vector<16x64xbf16>
    %cst_16 = arith.constant dense<0.000000e+00> : vector<16x64xf32>
    %31 = tpu.matmul %0, %30, %cst_16 {dimension_numbers = #tpu.dot_dimension_numbers<[1], [0], [0], [1], [0, 0, 1, 1], [], []>} : vector<16x16xbf16>, vector<16x64xbf16>, vector<16x64xf32> -> vector<16x64xf32>
    %cst_17 = arith.constant 2.000000e+00 : f32
    %32 = vector.broadcast %cst_17 : f32 to vector<16x64xf32>
    %33 = arith.mulf %32, %31 : vector<16x64xf32>
    %34 = arith.subf %33, %27 : vector<16x64xf32>
    %35 = arith.truncf %34 : vector<16x64xf32> to vector<16x64xbf16>
    %cst_18 = arith.constant dense<0.000000e+00> : vector<16x64xf32>
    %36 = tpu.matmul %0, %35, %cst_18 {dimension_numbers = #tpu.dot_dimension_numbers<[1], [0], [0], [1], [0, 0, 1, 1], [], []>} : vector<16x16xbf16>, vector<16x64xbf16>, vector<16x64xf32> -> vector<16x64xf32>
    %cst_19 = arith.constant 2.000000e+00 : f32
    %37 = vector.broadcast %cst_19 : f32 to vector<16x64xf32>
    %38 = arith.mulf %37, %36 : vector<16x64xf32>
    %39 = arith.subf %38, %29 : vector<16x64xf32>
    %40 = arith.truncf %39 : vector<16x64xf32> to vector<16x64xbf16>
    %cst_20 = arith.constant dense<0.000000e+00> : vector<16x64xf32>
    %41 = tpu.matmul %0, %40, %cst_20 {dimension_numbers = #tpu.dot_dimension_numbers<[1], [0], [0], [1], [0, 0, 1, 1], [], []>} : vector<16x16xbf16>, vector<16x64xbf16>, vector<16x64xf32> -> vector<16x64xf32>
    %cst_21 = arith.constant 2.000000e+00 : f32
    %42 = vector.broadcast %cst_21 : f32 to vector<16x64xf32>
    %43 = arith.mulf %42, %41 : vector<16x64xf32>
    %44 = arith.subf %43, %34 : vector<16x64xf32>
    %45 = arith.truncf %44 : vector<16x64xf32> to vector<16x64xbf16>
    %46 = tpu.concatenate %28, %30, %35, %40, %45 in 1 : vector<16x64xbf16>, vector<16x64xbf16>, vector<16x64xbf16>, vector<16x64xbf16>, vector<16x64xbf16> -> vector<16x320xbf16>
    %c0_22 = arith.constant 0 : index
    %c0_23 = arith.constant 0 : index
    %47 = vector.load %arg4[%c0_22, %c0_23] : memref<320x64xbf16, #tpu.memory_space<vmem>>, vector<320x64xbf16>
    %cst_24 = arith.constant dense<0.000000e+00> : vector<16x64xf32>
    %48 = tpu.matmul %46, %47, %cst_24 {dimension_numbers = #tpu.dot_dimension_numbers<[1], [0], [0], [1], [0, 0, 1, 1], [], []>} : vector<16x320xbf16>, vector<320x64xbf16>, vector<16x64xf32> -> vector<16x64xf32>
    %c0_25 = arith.constant 0 : index
    %c0_26 = arith.constant 0 : index
    %49 = vector.load %arg5[%c0_25, %c0_26] : memref<1x64xf32, #tpu.memory_space<vmem>>, vector<1x64xf32>
    %50 = vector.broadcast %49 : vector<1x64xf32> to vector<16x64xf32>
    %51 = arith.addf %48, %50 : vector<16x64xf32>
    %cst_27 = arith.constant 0.000000e+00 : f32
    %52 = vector.broadcast %cst_27 : f32 to vector<16x64xf32>
    %53 = arith.maximumf %51, %52 : vector<16x64xf32>
    %54 = arith.truncf %53 : vector<16x64xf32> to vector<16x64xbf16>
    %cst_28 = arith.constant dense<0.000000e+00> : vector<16x64xf32>
    %55 = tpu.matmul %0, %54, %cst_28 {dimension_numbers = #tpu.dot_dimension_numbers<[1], [0], [0], [1], [0, 0, 1, 1], [], []>} : vector<16x16xbf16>, vector<16x64xbf16>, vector<16x64xf32> -> vector<16x64xf32>
    %56 = arith.truncf %55 : vector<16x64xf32> to vector<16x64xbf16>
    %cst_29 = arith.constant dense<0.000000e+00> : vector<16x64xf32>
    %57 = tpu.matmul %0, %56, %cst_29 {dimension_numbers = #tpu.dot_dimension_numbers<[1], [0], [0], [1], [0, 0, 1, 1], [], []>} : vector<16x16xbf16>, vector<16x64xbf16>, vector<16x64xf32> -> vector<16x64xf32>
    %cst_30 = arith.constant 2.000000e+00 : f32
    %58 = vector.broadcast %cst_30 : f32 to vector<16x64xf32>
    %59 = arith.mulf %58, %57 : vector<16x64xf32>
    %60 = arith.subf %59, %53 : vector<16x64xf32>
    %61 = arith.truncf %60 : vector<16x64xf32> to vector<16x64xbf16>
    %cst_31 = arith.constant dense<0.000000e+00> : vector<16x64xf32>
    %62 = tpu.matmul %0, %61, %cst_31 {dimension_numbers = #tpu.dot_dimension_numbers<[1], [0], [0], [1], [0, 0, 1, 1], [], []>} : vector<16x16xbf16>, vector<16x64xbf16>, vector<16x64xf32> -> vector<16x64xf32>
    %cst_32 = arith.constant 2.000000e+00 : f32
    %63 = vector.broadcast %cst_32 : f32 to vector<16x64xf32>
    %64 = arith.mulf %63, %62 : vector<16x64xf32>
    %65 = arith.subf %64, %55 : vector<16x64xf32>
    %66 = arith.truncf %65 : vector<16x64xf32> to vector<16x64xbf16>
    %cst_33 = arith.constant dense<0.000000e+00> : vector<16x64xf32>
    %67 = tpu.matmul %0, %66, %cst_33 {dimension_numbers = #tpu.dot_dimension_numbers<[1], [0], [0], [1], [0, 0, 1, 1], [], []>} : vector<16x16xbf16>, vector<16x64xbf16>, vector<16x64xf32> -> vector<16x64xf32>
    %cst_34 = arith.constant 2.000000e+00 : f32
    %68 = vector.broadcast %cst_34 : f32 to vector<16x64xf32>
    %69 = arith.mulf %68, %67 : vector<16x64xf32>
    %70 = arith.subf %69, %60 : vector<16x64xf32>
    %71 = arith.truncf %70 : vector<16x64xf32> to vector<16x64xbf16>
    %72 = tpu.concatenate %54, %56, %61, %66, %71 in 1 : vector<16x64xbf16>, vector<16x64xbf16>, vector<16x64xbf16>, vector<16x64xbf16>, vector<16x64xbf16> -> vector<16x320xbf16>
    %c0_35 = arith.constant 0 : index
    %c0_36 = arith.constant 0 : index
    %73 = vector.load %arg6[%c0_35, %c0_36] : memref<320x64xbf16, #tpu.memory_space<vmem>>, vector<320x64xbf16>
    %cst_37 = arith.constant dense<0.000000e+00> : vector<16x64xf32>
    %74 = tpu.matmul %72, %73, %cst_37 {dimension_numbers = #tpu.dot_dimension_numbers<[1], [0], [0], [1], [0, 0, 1, 1], [], []>} : vector<16x320xbf16>, vector<320x64xbf16>, vector<16x64xf32> -> vector<16x64xf32>
    %c0_38 = arith.constant 0 : index
    %c0_39 = arith.constant 0 : index
    %75 = vector.load %arg7[%c0_38, %c0_39] : memref<1x64xf32, #tpu.memory_space<vmem>>, vector<1x64xf32>
    %76 = vector.broadcast %75 : vector<1x64xf32> to vector<16x64xf32>
    %77 = arith.addf %74, %76 : vector<16x64xf32>
    %cst_40 = arith.constant 0.000000e+00 : f32
    %78 = vector.broadcast %cst_40 : f32 to vector<16x64xf32>
    %79 = arith.maximumf %77, %78 : vector<16x64xf32>
    %80 = arith.truncf %79 : vector<16x64xf32> to vector<16x64xbf16>
    %c0_41 = arith.constant 0 : index
    %c0_42 = arith.constant 0 : index
    %81 = vector.load %arg8[%c0_41, %c0_42] : memref<64x8xbf16, #tpu.memory_space<vmem>>, vector<64x8xbf16>
    %cst_43 = arith.constant dense<0.000000e+00> : vector<16x8xf32>
    %82 = tpu.matmul %80, %81, %cst_43 {dimension_numbers = #tpu.dot_dimension_numbers<[1], [0], [0], [1], [0, 0, 1, 1], [], []>} : vector<16x64xbf16>, vector<64x8xbf16>, vector<16x8xf32> -> vector<16x8xf32>
    %c0_44 = arith.constant 0 : index
    %c0_45 = arith.constant 0 : index
    %83 = vector.load %arg9[%c0_44, %c0_45] : memref<1x8xf32, #tpu.memory_space<vmem>>, vector<1x8xf32>
    %84 = vector.broadcast %83 : vector<1x8xf32> to vector<16x8xf32>
    %85 = arith.addf %82, %84 : vector<16x8xf32>
    %c0_46 = arith.constant 0 : index
    %c0_47 = arith.constant 0 : index
    %86 = vector.load %arg10[%c0_46, %c0_47] : memref<16x8xf32, #tpu.memory_space<vmem>>, vector<16x8xf32>
    tpu.vector_store %arg10[%c0_46, %c0_47], %85 {strides = array<i32>} : memref<16x8xf32, #tpu.memory_space<vmem>>, vector<16x8xf32>,
    return
  }
}

</mosaic_0001>

<bundles_post_ra>
// kernel: chebnet_forward.1
= control target key start
LH: loop header
LB: loop body
LE: loop exit
PB: predicated region body
PF: predicated region fallthrough
CT: control target
= control target key end

     0   :  { %v1648_v0 = vmov 0.0   ;;  %vm1649_vm0 = vmmov 0   ;;  %vm46_vm1 = vcmask 130048   ;;  %s1652_s19 = smov 24   ;;  %vm284_vm2 = vcmask 1043456   ;;  %s1653_s26 = smov 32   ;;  %s2026_s1 = inlined_call_operand.vmem [shape: f32[16,8], index: 1, kind: input, shape index: {}]   ;;  %s2027_s0 = inlined_call_operand.vmem [shape: bf16[16,16], index: 0, kind: input, shape index: {}]   ;;  %s2028_s2 = inlined_call_operand.vmem [shape: bf16[40,64], index: 2, kind: input, shape index: {}]   ;;  %s2029_s3 = inlined_call_operand.vmem [shape: f32[1,64], index: 3, kind: input, shape index: {}]   ;;  %s2030_s4 = inlined_call_operand.vmem [shape: bf16[320,64], index: 4, kind: input, shape index: {}]   ;;  %s2031_s5 = inlined_call_operand.vmem [shape: f32[1,64], index: 5, kind: input, shape index: {}]   ;;  %s2032_s6 = inlined_call_operand.vmem [shape: bf16[320,64], index: 6, kind: input, shape index: {}]   ;;  %s2033_s8 = inlined_call_operand.vmem [shape: bf16[64,8], index: 8, kind: input, shape index: {}]   ;;  %s2034_s7 = inlined_call_operand.vmem [shape: f32[1,64], index: 7, kind: input, shape index: {}]   ;;  %s2035_s9 = inlined_call_operand.vmem [shape: f32[1,8], index: 9, kind: input, shape index: {}]   ;;  %s2036_s10 = inlined_call_operand.vmem [shape: f32[16,8], index: 10, kind: output, shape index: {}]  }
   0x1   :  { %1475 = vmatprep.subr.bf16.mxu0 %v1648_v0  ;;  %v38_v1 = vld [vmem:[%s2026_s1] sm:$0xff]  ;;  %v39_v2 = vld [vmem:[%s2026_s1 + $0x8] sm:$0xff]  ;;  %1477 = vmatprep.mubr.msk.bf16.mxu0 %vm1649_vm0, %v1648_v0  ;;  %s1650_s1 = smov 8   ;;  %v1603_v30 = vld [vmem:[%s2028_s2 + $0x10] ss:$0 sps:$4 sm:$0xff]   ;;  %vm242_vm3 = vcmask 64512  }
   0x2   :  { %v1719_v3 = vpack.c.bf16 %v39_v2, %v38_v1  ;;  %1481 = vmatprep.subr.bf16.mxu1 %v1648_v0  ;;  %1483 = vmatprep.mubr.msk.bf16.mxu1 %vm1649_vm0, %v1648_v0  ;;  %v1727_v4 = vld [vmem:[%s2027_s0] sm:$0xff]   ;;  %s1651_s0 = smov 16   ;;  %v1602_v29 = vld [vmem:[%s2028_s2 + $0x8] sm:$0xff]   ;;  %v286_v31 = vsel %vm284_vm2, %v1603_v30, 0  ;;  %vm248_vm4 = vcmask 195584   ;;  %vm251_vm5 = vcmask 261120  }
   0x3   :  { %v1601_v28 = vld [vmem:[%s2028_s2] sm:$0xff]   ;;  %vm281_vm6 = vcmask 326656   ;;  %vm518_vm7 = vcmask 523264  }
   0x4   :  { %1476 = vmatpush3.bf16.msra.mxu0 %v1719_v3  ;;  %v1325_v49 = vld [vmem:[%s2029_s3] ss:$0 sm:$0xff]  ;;  %s1654_s3 = smov 64  }
   0x5   :  { %1487 = vmatprep.subr.bf16.mxu0 %v1648_v0 }
   0x7   :  { %1478 = vmatmul.mubr.msk.bf16.vlgmr.msra.gmra.mrb[0].mxu0 %vm46_vm1, %v1727_v4 }
   0x8   :  { %1489 = vmatprep.mubr.msk.bf16.mxu0 %vm1649_vm0, %v1648_v0 }
  0xda   :  { %v84_v5 = vpop.f32.mrb[0].mxu0 }
  0xdb   :  { %v1479_v6 = vpop.f32.mrb[1].mxu0 }
  0xdc   :  { %v87_v7 = vpop.f32.mrb[2].mxu0 }
  0xdd   :  { %v1480_v8 = vpop.f32.mrb[3].mxu0  ;;  %v91_v9 = vpack.c.bf16 %v87_v7, %v84_v5 }
  0xdf   :  { %231 = vrot.lane.b32.xlu0 %v91_v9, %s1650_s1  ;;  %1482 = vmatpush3.bf16.msra.mxu1 %v91_v9 }
  0xe0   :  { %1493 = vmatprep.subr.bf16.mxu1 %v1648_v0 }
  0xe2   :  { %1484 = vmatmul.mubr.msk.bf16.vlgmr.msra.gmra.mrb[0].mxu1 %vm46_vm1, %v1727_v4 }
  0xe3   :  { %1495 = vmatprep.mubr.msk.bf16.mxu1 %vm1649_vm0, %v1648_v0 }
 0x151   :  { %v232_v41 = vpop.permute.xlu0 %231 }
 0x152   :  { %v245_v44 = vsel %vm242_vm3, %v1719_v3, %v232_v41 }
 0x1b5   :  { %v126_v10 = vpop.f32.mrb[0].mxu1 }
 0x1b6   :  { %v133_v11 = vmul.f32 2.0, %v126_v10  ;;  %v1485_v12 = vpop.f32.mrb[1].mxu1 }
 0x1b7   :  { %v129_v13 = vpop.f32.mrb[2].mxu1  ;;  %v1605_v12 = vld [vmem:[%s2030_s4] sm:$0xff]  }
 0x1b8   :  { %v134_v14 = vmul.f32 2.0, %v129_v13  ;;  %v1486_v15 = vpop.f32.mrb[3].mxu1  ;;  %v135_v16 = vsub.f32 %v133_v11, %v38_v1  ;;  %v1604_v11 = vld [vmem:[%s2030_s4 + $0x40] sm:$0xff]   ;;  %v1606_v13 = vld [vmem:[%s2030_s4 + $0x48] sm:$0xff]  }
 0x1b9   :  { %v1608_v15 = vld [vmem:[%s2030_s4 + $0x50] sm:$0xff]  }
 0x1ba   :  { %v136_v17 = vsub.f32 %v134_v14, %v39_v2  ;;  %v1607_v14 = vld [vmem:[%s2030_s4 + $0x8] sm:$0xff]  }
 0x1bc   :  { %v137_v18 = vpack.c.bf16 %v136_v17, %v135_v16 }
 0x1be   :  { %234 = vrot.lane.b32.xlu0 %v137_v18, %s1651_s0  ;;  %1488 = vmatpush3.bf16.msra.mxu0 %v137_v18  ;;  %v1611_v18 = vld [vmem:[%s2030_s4 + $0x18] sm:$0xff]  }
 0x1bf   :  { %1499 = vmatprep.subr.bf16.mxu0 %v1648_v0 }
 0x1c1   :  { %1490 = vmatmul.mubr.msk.bf16.vlgmr.msra.gmra.mrb[4].mxu0 %vm46_vm1, %v1727_v4 }
 0x1c2   :  { %1505 = vmatprep.mubr.msk.bf16.mxu0 %vm1649_vm0, %v1648_v0  ;;  %1500 = vmatpush3.bf16.msra.mxu0 %v1601_v28 }
 0x1c3   :  { %1501 = vmatprep.subr.bf16.mxu0 %v1648_v0 }
 0x1c6   :  { %1502 = vmatpush3.bf16.msra.mxu0 %v1602_v29 }
 0x1c7   :  { %1503 = vmatprep.subr.bf16.mxu0 %v1648_v0 }
 0x1ca   :  { %1504 = vmatpush3.bf16.msra.mxu0 %v286_v31 }
 0x1cb   :  { %1521 = vmatprep.subr.bf16.mxu0 %v1648_v0 }
 0x230   :  { %v235_v42 = vpop.permute.xlu0 %234 }
 0x231   :  { %v247_v45 = vsel %vm46_vm1, %v245_v44, %v235_v42 }
 0x294   :  { %v172_v19 = vpop.f32.mrb[4].mxu0 }
 0x295   :  { %v179_v20 = vmul.f32 2.0, %v172_v19  ;;  %v1491_v21 = vpop.f32.mrb[5].mxu0  ;;  %v1612_v19 = vld [vmem:[%s2030_s4 + $0x60] sm:$0xff]  }
 0x296   :  { %v175_v22 = vpop.f32.mrb[6].mxu0  ;;  %v1614_v21 = vld [vmem:[%s2030_s4 + $0x68] sm:$0xff]  }
 0x297   :  { %v181_v23 = vsub.f32 %v179_v20, %v84_v5  ;;  %v180_v24 = vmul.f32 2.0, %v175_v22  ;;  %v1492_v25 = vpop.f32.mrb[7].mxu0  ;;  %v1613_v20 = vld [vmem:[%s2030_s4 + $0x20] sm:$0xff]   ;;  %v1615_v22 = vld [vmem:[%s2030_s4 + $0x28] sm:$0xff]  }
 0x298   :  { %v1618_v25 = vld [vmem:[%s2030_s4 + $0x78] sm:$0xff]  }
 0x299   :  { %v182_v26 = vsub.f32 %v180_v24, %v87_v7  ;;  %v1617_v24 = vld [vmem:[%s2030_s4 + $0x30] sm:$0xff]  }
 0x29b   :  { %v183_v27 = vpack.c.bf16 %v182_v26, %v181_v23  ;;  %v1616_v23 = vld [vmem:[%s2030_s4 + $0x70] sm:$0xff]   ;;  %v1619_v26 = vld [vmem:[%s2030_s4 + $0x38] sm:$0xff]  }
 0x29d   :  { %237 = vrot.lane.b32.xlu1 %v183_v27, %s1652_s19  ;;  %1494 = vmatpush3.bf16.msra.mxu1 %v183_v27 }
 0x29e   :  { %1509 = vmatprep.subr.bf16.mxu1 %v1648_v0 }
 0x2a0   :  { %1496 = vmatmul.mubr.msk.bf16.vlgmr.msra.gmra.mrb[4].mxu1 %vm46_vm1, %v1727_v4 }
 0x2a1   :  { %1511 = vmatprep.mubr.msk.bf16.mxu1 %vm1649_vm0, %v1648_v0 }
 0x30f   :  { %v238_v43 = vpop.permute.xlu1 %237 }
 0x310   :  { %v250_v46 = vsel %vm248_vm4, %v247_v45, %v238_v43 }
 0x373   :  { %v218_v32 = vpop.f32.mrb[4].mxu1 }
 0x374   :  { %v225_v33 = vmul.f32 2.0, %v218_v32  ;;  %v1497_v34 = vpop.f32.mrb[5].mxu1 }
 0x375   :  { %v221_v35 = vpop.f32.mrb[6].mxu1 }
 0x376   :  { %v226_v36 = vmul.f32 2.0, %v221_v35  ;;  %v1498_v37 = vpop.f32.mrb[7].mxu1  ;;  %v227_v38 = vsub.f32 %v225_v33, %v135_v16  ;;  %v1609_v16 = vld [vmem:[%s2030_s4 + $0x10] sm:$0xff]  }
 0x377   :  { %v1621_v37 = vld [vmem:[%s2030_s4 + $0x88] sm:$0xff]  }
 0x378   :  { %v228_v39 = vsub.f32 %v226_v36, %v136_v17  ;;  %v1610_v17 = vld [vmem:[%s2030_s4 + $0x58] sm:$0xff]   ;;  %v1620_v36 = vld [vmem:[%s2030_s4 + $0x80] sm:$0xff]  }
 0x37a   :  { %v229_v40 = vpack.c.bf16 %v228_v39, %v227_v38  ;;  %v1622_v38 = vld [vmem:[%s2030_s4 + $0x90] sm:$0xff]   ;;  %v1623_v39 = vld [vmem:[%s2030_s4 + $0x98] sm:$0xff]  }
 0x37c   :  { %240 = vrot.lane.b32.xlu1 %v229_v40, %s1653_s26 }
 0x3ee   :  { %v241_v47 = vpop.permute.xlu1 %240 }
 0x3ef   :  { %v253_v48 = vsel %vm251_vm5, %v250_v46, %v241_v47 }
 0x3f0   :  { %1506 = vmatmul.mubr.msk.bf16.vlgmr.msra.gmra.mrb[8].mxu0 %vm281_vm6, %v253_v48 }
 0x3f1   :  { %1523 = vmatprep.mubr.msk.bf16.mxu0 %vm1649_vm0, %v1648_v0 }
 0x4c3   :  { %v322_v50 = vpop.f32.mrb[8].mxu0 }
 0x4c4   :  { %v323_v51 = vadd.f32 %v1325_v49, %v322_v50  ;;  %v1507_v52 = vpop.f32.mrb[9].mxu0 }
 0x4c5   :  { %v325_v53 = vpop.f32.mrb[10].mxu0 }
 0x4c6   :  { %v326_v54 = vadd.f32 %v1325_v49, %v325_v53  ;;  %v1508_v55 = vpop.f32.mrb[11].mxu0  ;;  %v329_v56 = vmax.f32 %v323_v51, 0.0 }
 0x4c8   :  { %v330_v57 = vmax.f32 %v326_v54, 0.0 }
 0x4ca   :  { %v1770_v58 = vpack.c.bf16 %v330_v57, %v329_v56 }
 0x4cc   :  { %1510 = vmatpush3.bf16.msra.mxu1 %v1770_v58 }
 0x4cd   :  { %1515 = vmatprep.subr.bf16.mxu1 %v1648_v0 }
 0x4cf   :  { %1512 = vmatmul.mubr.msk.bf16.vlgmr.msra.gmra.mrb[8].mxu1 %vm46_vm1, %v1727_v4 }
 0x4d0   :  { %1517 = vmatprep.mubr.msk.bf16.mxu1 %vm1649_vm0, %v1648_v0 }
 0x5a2   :  { %v1778_v59 = vpop.f32.mrb[8].mxu1 }
 0x5a3   :  { %v1513_v60 = vpop.f32.mrb[9].mxu1 }
 0x5a4   :  { %v1780_v61 = vpop.f32.mrb[10].mxu1 }
 0x5a5   :  { %v373_v62 = vpack.c.bf16 %v1780_v61, %v1778_v59  ;;  %v1514_v63 = vpop.f32.mrb[11].mxu1 }
 0x5a7   :  { %513 = vrot.lane.b32.xlu1 %v373_v62, %s1654_s3  ;;  %1516 = vmatpush3.bf16.msra.mxu1 %v373_v62 }
 0x5a8   :  { %1527 = vmatprep.subr.bf16.mxu1 %v1648_v0 }
 0x5aa   :  { %1518 = vmatmul.mubr.msk.bf16.vlgmr.msra.gmra.mrb[12].mxu1 %vm46_vm1, %v1727_v4 }
 0x5ab   :  { %1529 = vmatprep.mubr.msk.bf16.mxu1 %vm1649_vm0, %v1648_v0 }
 0x619   :  { %v514_v40 = vpop.permute.xlu1 %513 }
 0x61a   :  { %v521_v43 = vsel %vm518_vm7, %v1770_v58, %v514_v40 }
 0x67d   :  { %v408_v1 = vpop.f32.mrb[12].mxu1 }
 0x67e   :  { %v415_v2 = vmul.f32 2.0, %v408_v1  ;;  %v1519_v3 = vpop.f32.mrb[13].mxu1 }
 0x67f   :  { %v411_v5 = vpop.f32.mrb[14].mxu1 }
 0x680   :  { %v416_v6 = vmul.f32 2.0, %v411_v5  ;;  %v1520_v7 = vpop.f32.mrb[15].mxu1  ;;  %v1790_v8 = vsub.f32 %v415_v2, %v329_v56 }
 0x682   :  { %v1792_v9 = vsub.f32 %v416_v6, %v330_v57 }
 0x684   :  { %v1796_v10 = vpack.c.bf16 %v1792_v9, %v1790_v8 }
 0x686   :  { %1522 = vmatpush3.bf16.msra.mxu0 %v1796_v10 }
 0x687   :  { %1408 = vmatprep.subr.bf16.mxu0 %v1604_v11 }
 0x689   :  { %1524 = vmatmul.mubr.msk.bf16.vlgmr.msra.gmra.mrb[12].mxu0 %vm46_vm1, %v1727_v4 }
 0x68a   :  { %1409 = vmatpush3.bf16.msra.mxu0 %v1605_v12 }
 0x68b   :  { %1410 = vmatprep.subr.bf16.mxu0 %v1606_v13 }
 0x68e   :  { %1411 = vmatpush3.bf16.msra.mxu0 %v1607_v14 }
 0x68f   :  { %1412 = vmatprep.subr.bf16.mxu0 %v1608_v15 }
 0x692   :  { %1413 = vmatpush3.bf16.msra.mxu0 %v1609_v16 }
 0x693   :  { %1414 = vmatprep.subr.bf16.mxu0 %v1610_v17 }
 0x696   :  { %1415 = vmatpush3.bf16.msra.mxu0 %v1611_v18 }
 0x697   :  { %1416 = vmatprep.subr.bf16.mxu0 %v1612_v19 }
 0x69a   :  { %1417 = vmatpush3.bf16.msra.mxu0 %v1613_v20 }
 0x69b   :  { %1418 = vmatprep.subr.bf16.mxu0 %v1614_v21 }
 0x69e   :  { %1419 = vmatpush3.bf16.msra.mxu0 %v1615_v22 }
 0x69f   :  { %1420 = vmatprep.subr.bf16.mxu0 %v1616_v23  ;;  %v1624_v23 = vld [vmem:[%s2032_s6 + $0x40] sm:$0xff]  }
 0x6a2   :  { %1421 = vmatpush3.bf16.msra.mxu0 %v1617_v24  ;;  %v1625_v24 = vld [vmem:[%s2032_s6] sm:$0xff]  }
 0x6a3   :  { %1422 = vmatprep.subr.bf16.mxu0 %v1618_v25  ;;  %v1626_v25 = vld [vmem:[%s2032_s6 + $0x48] sm:$0xff]  }
 0x6a6   :  { %1423 = vmatpush3.bf16.msra.mxu0 %v1619_v26  ;;  %v1627_v26 = vld [vmem:[%s2032_s6 + $0x8] sm:$0xff]  }
 0x6a7   :  { %1557 = vmatprep.subr.bf16.mxu0 %v1648_v0 }
 0x75c   :  { %v454_v27 = vpop.f32.mrb[12].mxu0 }
 0x75d   :  { %v461_v28 = vmul.f32 2.0, %v454_v27  ;;  %v1525_v29 = vpop.f32.mrb[13].mxu0  ;;  %v1628_v27 = vld [vmem:[%s2032_s6 + $0x50] sm:$0xff]  }
 0x75e   :  { %v457_v30 = vpop.f32.mrb[14].mxu0  ;;  %v1630_v29 = vld [vmem:[%s2032_s6 + $0x58] sm:$0xff]  }
 0x75f   :  { %v463_v31 = vsub.f32 %v461_v28, %v1778_v59  ;;  %v462_v32 = vmul.f32 2.0, %v457_v30  ;;  %v1526_v33 = vpop.f32.mrb[15].mxu0  ;;  %v1334_v59 = vld [vmem:[%s2031_s5] ss:$0 sm:$0xff]  ;;  %v1629_v28 = vld [vmem:[%s2032_s6 + $0x10] sm:$0xff]   ;;  %v1631_v30 = vld [vmem:[%s2032_s6 + $0x18] sm:$0xff]  }
 0x760   :  { %v1634_v33 = vld [vmem:[%s2032_s6 + $0x68] sm:$0xff]  }
 0x761   :  { %v464_v34 = vsub.f32 %v462_v32, %v1780_v61  ;;  %v1633_v32 = vld [vmem:[%s2032_s6 + $0x20] sm:$0xff]  }
 0x763   :  { %v465_v35 = vpack.c.bf16 %v464_v34, %v463_v31  ;;  %v1632_v31 = vld [vmem:[%s2032_s6 + $0x60] sm:$0xff]   ;;  %v1635_v34 = vld [vmem:[%s2032_s6 + $0x28] sm:$0xff]  }
 0x765   :  { %516 = vrot.lane.b32.xlu0 %v465_v35, %s1654_s3  ;;  %1528 = vmatpush3.bf16.msra.mxu1 %v465_v35  ;;  %v1636_v35 = vld [vmem:[%s2032_s6 + $0x70] sm:$0xff]  }
 0x766   :  { %1533 = vmatprep.subr.bf16.mxu1 %v1648_v0 }
 0x768   :  { %1530 = vmatmul.mubr.msk.bf16.vlgmr.msra.gmra.mrb[16].mxu1 %vm46_vm1, %v1727_v4 }
 0x769   :  { %1534 = vmatpush3.bf16.msra.mxu1 %v1620_v36  ;;  %1541 = vmatprep.mubr.msk.bf16.mxu1 %vm1649_vm0, %v1648_v0  ;;  %v1637_v36 = vld [vmem:[%s2032_s6 + $0x30] sm:$0xff]  }
 0x76a   :  { %1535 = vmatprep.subr.bf16.mxu1 %v1648_v0 }
 0x76d   :  { %1536 = vmatpush3.bf16.msra.mxu1 %v1621_v37  ;;  %v1638_v37 = vld [vmem:[%s2032_s6 + $0x78] sm:$0xff]  }
 0x76e   :  { %1537 = vmatprep.subr.bf16.mxu1 %v1648_v0 }
 0x771   :  { %1538 = vmatpush3.bf16.msra.mxu1 %v1622_v38  ;;  %v1639_v38 = vld [vmem:[%s2032_s6 + $0x38] sm:$0xff]  }
 0x772   :  { %1539 = vmatprep.subr.bf16.mxu1 %v1648_v0 }
 0x775   :  { %1540 = vmatpush3.bf16.msra.mxu1 %v1623_v39 }
 0x776   :  { %1545 = vmatprep.subr.bf16.mxu1 %v1648_v0 }
 0x7d7   :  { %v517_v41 = vpop.permute.xlu0 %516 }
 0x7d8   :  { %v525_v42 = vsel %vm518_vm7, %v1796_v10, %v517_v41 }
 0x7d9   :  { %729 = vmatprep.mubr.bf16.mxu0 %v525_v42 }
 0x7da   :  { %730 = vmatmul.mubr.bf16.vlgmr.msra.gmra.mrb[16].mxu0 %v521_v43 }
 0x7db   :  { %1559 = vmatprep.mubr.msk.bf16.mxu0 %vm1649_vm0, %v1648_v0 }
 0x83b   :  { %v500_v44 = vpop.f32.mrb[16].mxu1 }
 0x83c   :  { %v507_v45 = vmul.f32 2.0, %v500_v44  ;;  %v1531_v46 = vpop.f32.mrb[17].mxu1 }
 0x83d   :  { %v503_v47 = vpop.f32.mrb[18].mxu1 }
 0x83e   :  { %v508_v48 = vmul.f32 2.0, %v503_v47  ;;  %v1532_v49 = vpop.f32.mrb[19].mxu1  ;;  %v509_v50 = vsub.f32 %v507_v45, %v1790_v8 }
 0x83f   :  { %v1641_v49 = vld [vmem:[%s2032_s6 + $0x88] sm:$0xff]  }
 0x840   :  { %v510_v51 = vsub.f32 %v508_v48, %v1792_v9  ;;  %v1640_v48 = vld [vmem:[%s2032_s6 + $0x80] sm:$0xff]  }
 0x842   :  { %v511_v52 = vpack.c.bf16 %v510_v51, %v509_v50  ;;  %v1642_v50 = vld [vmem:[%s2032_s6 + $0x90] sm:$0xff]  }
 0x844   :  { %1542 = vmatmul.mubr.msk.bf16.vlgmr.msra.gmra.mrb[20].mxu1 %vm518_vm7, %v511_v52 }
 0x845   :  { %1547 = vmatprep.mubr.msk.bf16.mxu1 %vm1649_vm0, %v1648_v0 }
 0x8ad   :  { %v1424_v53 = vpop.f32.mrb[16].mxu0 }
 0x8ae   :  { %v1425_v54 = vpop.f32.mrb[17].mxu0 }
 0x8af   :  { %v1426_v55 = vadd.f32 %v1425_v54, %v1424_v53  ;;  %v1427_v56 = vpop.f32.mrb[18].mxu0 }
 0x8b0   :  { %v1428_v57 = vpop.f32.mrb[19].mxu0 }
 0x8b1   :  { %v1429_v58 = vadd.f32 %v1428_v57, %v1427_v56  ;;  %v732_v60 = vadd.f32 %v1426_v55, %v1334_v59 }
 0x8b3   :  { %v735_v1 = vadd.f32 %v1429_v58, %v1334_v59 }
 0x917   :  { %v772_v61 = vpop.f32.mrb[20].mxu1 }
 0x918   :  { %v773_v62 = vadd.f32 %v772_v61, %v732_v60  ;;  %v1543_v63 = vpop.f32.mrb[21].mxu1 }
 0x919   :  { %v775_v2 = vpop.f32.mrb[22].mxu1  ;;  %v1644_v63 = vld [vmem:[%s2033_s8] sm:$0xff]  }
 0x91a   :  { %v776_v3 = vadd.f32 %v775_v2, %v735_v1  ;;  %v1544_v5 = vpop.f32.mrb[23].mxu1  ;;  %v779_v6 = vmax.f32 %v773_v62, 0.0  ;;  %v1645_v2 = vld [vmem:[%s2033_s8 + $0x8] sm:$0xff]  }
 0x91b   :  { %v1647_v5 = vld [vmem:[%s2033_s8 + $0x18] sm:$0xff]  }
 0x91c   :  { %v780_v7 = vmax.f32 %v776_v3, 0.0  ;;  %v1646_v3 = vld [vmem:[%s2033_s8 + $0x10] sm:$0xff]  }
 0x91e   :  { %v1888_v8 = vpack.c.bf16 %v780_v7, %v779_v6 }
 0x920   :  { %1546 = vmatpush3.bf16.msra.mxu1 %v1888_v8 }
 0x921   :  { %1551 = vmatprep.subr.bf16.mxu1 %v1648_v0 }
 0x923   :  { %1548 = vmatmul.mubr.msk.bf16.vlgmr.msra.gmra.mrb[24].mxu1 %vm46_vm1, %v1727_v4 }
 0x924   :  { %1553 = vmatprep.mubr.msk.bf16.mxu1 %vm1649_vm0, %v1648_v0 }
 0x9f6   :  { %v1896_v9 = vpop.f32.mrb[24].mxu1 }
 0x9f7   :  { %v1549_v10 = vpop.f32.mrb[25].mxu1 }
 0x9f8   :  { %v819_v11 = vpop.f32.mrb[26].mxu1 }
 0x9f9   :  { %v823_v12 = vpack.c.bf16 %v819_v11, %v1896_v9  ;;  %v1550_v13 = vpop.f32.mrb[27].mxu1 }
 0x9fb   :  { %963 = vrot.lane.b32.xlu1 %v823_v12, %s1654_s3  ;;  %1552 = vmatpush3.bf16.msra.mxu1 %v823_v12  ;;  %v1360_v12 = vld [vmem:[%s2034_s7] ss:$0 sm:$0xff] }
 0x9fc   :  { %1563 = vmatprep.subr.bf16.mxu1 %v1648_v0 }
 0x9fe   :  { %1554 = vmatmul.mubr.msk.bf16.vlgmr.msra.gmra.mrb[28].mxu1 %vm46_vm1, %v1727_v4 }
 0x9ff   :  { %1565 = vmatprep.mubr.msk.bf16.mxu1 %vm1649_vm0, %v1648_v0 }
 0xa6d   :  { %v964_v51 = vpop.permute.xlu1 %963 }
 0xa6e   :  { %v970_v54 = vsel %vm518_vm7, %v1888_v8, %v964_v51 }
 0xad1   :  { %v858_v14 = vpop.f32.mrb[28].mxu1 }
 0xad2   :  { %v865_v15 = vmul.f32 2.0, %v858_v14  ;;  %v1555_v16 = vpop.f32.mrb[29].mxu1 }
 0xad3   :  { %v861_v17 = vpop.f32.mrb[30].mxu1 }
 0xad4   :  { %v866_v18 = vmul.f32 2.0, %v861_v17  ;;  %v1556_v19 = vpop.f32.mrb[31].mxu1  ;;  %v1905_v20 = vsub.f32 %v865_v15, %v779_v6 }
 0xad6   :  { %v1907_v21 = vsub.f32 %v866_v18, %v780_v7 }
 0xad8   :  { %v1911_v22 = vpack.c.bf16 %v1907_v21, %v1905_v20 }
 0xada   :  { %1558 = vmatpush3.bf16.msra.mxu0 %v1911_v22 }
 0xadb   :  { %1443 = vmatprep.subr.bf16.mxu0 %v1624_v23  ;;  %v1382_v23 = vld [vmem:[%s2035_s9] ss:$0 sm:$0xff] }
 0xadd   :  { %1560 = vmatmul.mubr.msk.bf16.vlgmr.msra.gmra.mrb[20].mxu0 %vm46_vm1, %v1727_v4 }
 0xade   :  { %1444 = vmatpush3.bf16.msra.mxu0 %v1625_v24 }
 0xadf   :  { %1445 = vmatprep.subr.bf16.mxu0 %v1626_v25 }
 0xae2   :  { %1446 = vmatpush3.bf16.msra.mxu0 %v1627_v26 }
 0xae3   :  { %1447 = vmatprep.subr.bf16.mxu0 %v1628_v27 }
 0xae6   :  { %1448 = vmatpush3.bf16.msra.mxu0 %v1629_v28 }
 0xae7   :  { %1449 = vmatprep.subr.bf16.mxu0 %v1630_v29 }
 0xaea   :  { %1450 = vmatpush3.bf16.msra.mxu0 %v1631_v30 }
 0xaeb   :  { %1451 = vmatprep.subr.bf16.mxu0 %v1632_v31 }
 0xaee   :  { %1452 = vmatpush3.bf16.msra.mxu0 %v1633_v32 }
 0xaef   :  { %1453 = vmatprep.subr.bf16.mxu0 %v1634_v33 }
 0xaf2   :  { %1454 = vmatpush3.bf16.msra.mxu0 %v1635_v34 }
 0xaf3   :  { %1455 = vmatprep.subr.bf16.mxu0 %v1636_v35 }
 0xaf6   :  { %1456 = vmatpush3.bf16.msra.mxu0 %v1637_v36 }
 0xaf7   :  { %1457 = vmatprep.subr.bf16.mxu0 %v1638_v37 }
 0xafa   :  { %1458 = vmatpush3.bf16.msra.mxu0 %v1639_v38 }
 0xbb0   :  { %v904_v39 = vpop.f32.mrb[20].mxu0 }
 0xbb1   :  { %v911_v40 = vmul.f32 2.0, %v904_v39  ;;  %v1561_v41 = vpop.f32.mrb[21].mxu0 }
 0xbb2   :  { %v907_v42 = vpop.f32.mrb[22].mxu0 }
 0xbb3   :  { %v913_v43 = vsub.f32 %v911_v40, %v1896_v9  ;;  %v912_v44 = vmul.f32 2.0, %v907_v42  ;;  %v1562_v45 = vpop.f32.mrb[23].mxu0 }
 0xbb5   :  { %v914_v46 = vsub.f32 %v912_v44, %v819_v11 }
 0xbb7   :  { %v915_v47 = vpack.c.bf16 %v914_v46, %v913_v43 }
 0xbb9   :  { %966 = vrot.lane.b32.xlu0 %v915_v47, %s1654_s3  ;;  %1564 = vmatpush3.bf16.msra.mxu1 %v915_v47 }
 0xbba   :  { %1569 = vmatprep.subr.bf16.mxu1 %v1648_v0 }
 0xbbc   :  { %1566 = vmatmul.mubr.msk.bf16.vlgmr.msra.gmra.mrb[32].mxu1 %vm46_vm1, %v1727_v4  ;;  %v1643_v4 = vld [vmem:[%s2032_s6 + $0x98] sm:$0xff]  }
 0xbbd   :  { %1570 = vmatpush3.bf16.msra.mxu1 %v1640_v48  ;;  %1577 = vmatprep.mubr.msk.bf16.mxu1 %vm1649_vm0, %v1648_v0 }
 0xbbe   :  { %1571 = vmatprep.subr.bf16.mxu1 %v1648_v0 }
 0xbc1   :  { %1572 = vmatpush3.bf16.msra.mxu1 %v1641_v49 }
 0xbc2   :  { %1573 = vmatprep.subr.bf16.mxu1 %v1648_v0 }
 0xbc5   :  { %1574 = vmatpush3.bf16.msra.mxu1 %v1642_v50 }
 0xbc6   :  { %1575 = vmatprep.subr.bf16.mxu1 %v1648_v0 }
 0xbc9   :  { %1576 = vmatpush3.bf16.msra.mxu1 %v1643_v4 }
 0xbca   :  { %1581 = vmatprep.subr.bf16.mxu1 %v1648_v0 }
 0xc2b   :  { %v967_v52 = vpop.permute.xlu0 %966 }
 0xc2c   :  { %v974_v53 = vsel %vm518_vm7, %v1911_v22, %v967_v52 }
 0xc2d   :  { %1178 = vmatprep.mubr.bf16.mxu0 %v974_v53 }
 0xc2e   :  { %1179 = vmatmul.mubr.bf16.vlgmr.msra.gmra.mrb[24].mxu0 %v970_v54 }
 0xc8f   :  { %v950_v55 = vpop.f32.mrb[32].mxu1 }
 0xc90   :  { %v957_v56 = vmul.f32 2.0, %v950_v55  ;;  %v1567_v57 = vpop.f32.mrb[33].mxu1 }
 0xc91   :  { %v953_v58 = vpop.f32.mrb[34].mxu1 }
 0xc92   :  { %v958_v59 = vmul.f32 2.0, %v953_v58  ;;  %v1568_v60 = vpop.f32.mrb[35].mxu1  ;;  %v959_v61 = vsub.f32 %v957_v56, %v1905_v20 }
 0xc94   :  { %v960_v62 = vsub.f32 %v958_v59, %v1907_v21 }
 0xc96   :  { %v961_v1 = vpack.c.bf16 %v960_v62, %v959_v61 }
 0xc98   :  { %1578 = vmatmul.mubr.msk.bf16.vlgmr.msra.gmra.mrb[36].mxu1 %vm518_vm7, %v961_v1 }
 0xc99   :  { %1582 = vmatpush3.bf16.msra.mxu1 %v1644_v63  ;;  %1589 = vmatprep.mubr.msk.bf16.mxu1 %vm1649_vm0, %v1648_v0 }
 0xc9a   :  { %1583 = vmatprep.subr.bf16.mxu1 %v1648_v0 }
 0xc9d   :  { %1584 = vmatpush3.bf16.msra.mxu1 %v1645_v2 }
 0xc9e   :  { %1585 = vmatprep.subr.bf16.mxu1 %v1648_v0 }
 0xca1   :  { %1586 = vmatpush3.bf16.msra.mxu1 %v1646_v3 }
 0xca2   :  { %1587 = vmatprep.subr.bf16.mxu1 %v1648_v0 }
 0xca5   :  { %1588 = vmatpush3.bf16.msra.mxu1 %v1647_v5 }
 0xd01   :  { %v1459_v6 = vpop.f32.mrb[24].mxu0 }
 0xd02   :  { %v1460_v7 = vpop.f32.mrb[25].mxu0 }
 0xd03   :  { %v1461_v8 = vadd.f32 %v1460_v7, %v1459_v6  ;;  %v1462_v9 = vpop.f32.mrb[26].mxu0 }
 0xd04   :  { %v1463_v10 = vpop.f32.mrb[27].mxu0 }
 0xd05   :  { %v1464_v11 = vadd.f32 %v1463_v10, %v1462_v9  ;;  %v1181_v13 = vadd.f32 %v1461_v8, %v1360_v12 }
 0xd07   :  { %v1184_v0 = vadd.f32 %v1464_v11, %v1360_v12 }
 0xd6b   :  { %v1221_v14 = vpop.f32.mrb[36].mxu1 }
 0xd6c   :  { %v1222_v15 = vadd.f32 %v1221_v14, %v1181_v13  ;;  %v1579_v16 = vpop.f32.mrb[37].mxu1 }
 0xd6d   :  { %v1224_v17 = vpop.f32.mrb[38].mxu1 }
 0xd6e   :  { %v1225_v18 = vadd.f32 %v1224_v17, %v1184_v0  ;;  %v1580_v19 = vpop.f32.mrb[39].mxu1  ;;  %v1228_v20 = vmax.f32 %v1222_v15, 0.0 }
 0xd70   :  { %v1229_v21 = vmax.f32 %v1225_v18, 0.0 }
 0xd72   :  { %v1230_v22 = vpack.c.bf16 %v1229_v21, %v1228_v20 }
 0xd74   :  { %1590 = vmatmul.mubr.msk.bf16.vlgmr.msra.gmra.mrb[40].mxu1 %vm518_vm7, %v1230_v22 }
 0xe47   :  { %v1307_v24 = vpop.f32.mrb[40].mxu1 }
 0xe48   :  { %v1308_v25 = vadd.f32 %v1382_v23, %v1307_v24  ;;  %v1591_v26 = vpop.f32.mrb[41].mxu1 }
 0xe49   :  { %v1310_v27 = vpop.f32.mrb[42].mxu1 }
 0xe4a   :  { %1314 = vst.msk [vmem:[%s2036_s10] sm:$0xff] %vm242_vm3, %v1308_v25  ;;  %v1311_v28 = vadd.f32 %v1382_v23, %v1310_v27  ;;  %v1592_v29 = vpop.f32.mrb[43].mxu1 }
 0xe4c   :  { %1315 = vst.msk [vmem:[%s2036_s10 + $0x8] sm:$0xff] %vm242_vm3, %v1311_v28 }

</bundles_post_ra>
